<compile_context>
chip_gen: v7x
topology: tpu7x:2x2x1
jax: 0.10.0
libtpu: 0.0.40
codegen_flags: <defaults>
</compile_context>

<pallas_src>
import functools

import jax
import jax.numpy as jnp
from jax.experimental import pallas as pl
from jax.experimental.pallas import tpu as pltpu


def _round_up(x, m):
    return (x + m - 1) // m * m


def _dwsep_kernel(x_ref, dww_ref, pww_ref, pwb_ref, o_ref, xpf_ref,
                  *, K, dil, pad, H, W, N, C_in, C_out, left_pad):
    # x_ref   : (N*C_in, H*W)        flattened NCHW input (batch on sublanes)
    # dww_ref : (N*C_in, K*K)        depthwise weights, tiled over batch
    # pww_ref : (C_out, C_in)        pointwise (1x1) weights
    # pwb_ref : (C_out, 1)           folded (depthwise + pointwise) bias
    # o_ref   : (N*C_out, H*W)       flattened NCHW output
    # xpf_ref : (N*C_in, left_pad + H*W + pad*(W+1)) zero-padded flat scratch
    HW = H * W
    NC_in = N * C_in
    flat_w = xpf_ref.shape[1]
    right_pad = flat_w - left_pad - HW

    # Zero only the pad columns (single grid step; data window fully
    # overwritten below), then stage the flat input at a 128-aligned offset.
    if left_pad > 0:
        xpf_ref[:, :left_pad] = jnp.zeros((NC_in, left_pad), jnp.float32)
    if right_pad > 0:
        xpf_ref[:, left_pad + HW:left_pad + HW + right_pad] = jnp.zeros(
            (NC_in, right_pad), jnp.float32)
    xpf_ref[:, left_pad:left_pad + HW] = x_ref[...].astype(jnp.float32)

    # Hoisted: depthwise weights and the (few) distinct column masks.
    dww = dww_ref[...].astype(jnp.float32)                      # (N*C_in, K*K)
    j_idx = jax.lax.broadcasted_iota(jnp.int32, (1, HW), 1) % W
    masks = {}
    for kw in range(K):
        s = kw * dil - pad
        if s != 0 and s not in masks:
            masks[s] = (j_idx >= -s) & (j_idx < W - s)          # (1, HW)

    # Depthwise conv: K*K unrolled taps, all VPU FMAs on one dense
    # (N*C_in, HW) tile. Row under/overflow of a tap reads the zeroed pad
    # columns; column wraparound is killed by the hoisted masks.
    # NOTE: start offsets are not 128-aligned (loads include lane rotates);
    # at K=3/HW=256 VALU still binds first — if K/HW grow, switch to K
    # aligned row-base loads + pltpu.roll per kw instead of K*K slices.
    acc = jnp.zeros((NC_in, HW), jnp.float32)
    for kh in range(K):
        for kw in range(K):
            r = kh * dil - pad                                  # row offset
            s = kw * dil - pad                                  # col offset
            start = left_pad + r * W + s
            v = xpf_ref[:, start:start + HW]                    # (N*C_in, HW)
            if s != 0:
                v = jnp.where(masks[s], v, 0.0)
            t = kh * K + kw
            acc = acc + v * dww[:, t:t + 1]                     # lane bcast

    # Pointwise 1x1 conv: per-batch-slab C_in broadcast-FMAs on the VPU.
    # TODO(synk): for C_in >= ~32 or C_out >= ~64 replace this loop with a
    # single MXU jnp.dot(pww, acc_slab, preferred_element_type=jnp.float32).
    pww = pww_ref[...].astype(jnp.float32)                      # (C_out, C_in)
    pwb = pwb_ref[...]                                          # (C_out, 1)
    for n in range(N):
        a_n = acc[n * C_in:(n + 1) * C_in, :]                   # (C_in, HW)
        out = jnp.zeros((C_out, HW), jnp.float32)
        for ci in range(C_in):
            out = out + pww[:, ci:ci + 1] * a_n[ci:ci + 1, :]
        out = out + pwb                                         # folded bias
        o_ref[n * C_out:(n + 1) * C_out, :] = out.astype(o_ref.dtype)


def depthwise_separable_conv(x_nchw, dw_weight, dw_bias, pw_weight, pw_bias,
                             *, padding=0, dilation=1):
    """x_nchw: (N, C_in, H, W) -> (N, C_out, H_out, W_out); stride 1."""
    N, C_in, H, W = x_nchw.shape
    K = dw_weight.shape[-1]                      # dw_weight: (C_in, 1, K, K)
    C_out = pw_weight.shape[0]                   # pw_weight: (C_out, C_in, 1, 1)
    assert dw_weight.shape == (C_in, 1, K, K), dw_weight.shape
    assert pw_weight.shape[:2] == (C_out, C_in), pw_weight.shape

    H_out = H + 2 * padding - dilation * (K - 1)
    W_out = W + 2 * padding - dilation * (K - 1)
    # The lane-dense flat-shift formulation requires a "same"-size conv.
    # TODO(synk): support 2*padding != dilation*(kernel_size-1) (shape-changing
    # convs) with a padded-window variant of this kernel.
    if (H_out, W_out) != (H, W):
        raise NotImplementedError(
            "Pallas kernel requires 2*padding == dilation*(kernel_size-1).")

    HW = H * W
    pad_flat = padding * (W + 1)                             # max |flat offset|
    left_pad = _round_up(pad_flat, 128) if pad_flat else 0   # aligned staging
    flat_w = left_pad + HW + pad_flat

    # Free (contiguous) reshapes — no transpose / pad passes over HBM.
    x_flat = x_nchw.reshape(N * C_in, HW)
    dww = jnp.tile(dw_weight.reshape(C_in, K * K), (N, 1))   # (N*C_in, K*K)
    pww = pw_weight.reshape(C_out, C_in)
    # Fold the depthwise bias into the pointwise bias (pointwise is linear);
    # computed in f32 so it is exact.
    pwb_eff = (pw_bias + jnp.sum(pww * dw_bias[None, :], axis=1))
    pwb_eff = pwb_eff.reshape(C_out, 1).astype(jnp.float32)

    kernel = functools.partial(_dwsep_kernel, K=K, dil=dilation, pad=padding,
                               H=H, W=W, N=N, C_in=C_in, C_out=C_out,
                               left_pad=left_pad)

    flops = 2 * N * HW * (K * K * C_in + C_in * C_out)
    bytes_accessed = 4 * (N * C_in * HW + N * C_out * HW
                          + N * C_in * K * K + C_out * C_in + C_out)

    # Single collapsed grid step: the whole (tiny) problem runs as one dense
    # pass — no per-step pipeline overhead, no sub-8KiB DMA round trips.
    # If N / HW grow, reintroduce a "parallel" batch grid axis for v7x's 2 TCs.
    out_flat = pl.pallas_call(
        kernel,
        out_shape=jax.ShapeDtypeStruct((N * C_out, HW), x_nchw.dtype),
        grid_spec=pltpu.PrefetchScalarGridSpec(
            num_scalar_prefetch=0,
            grid=(1,),
            in_specs=[
                pl.BlockSpec((N * C_in, HW), lambda n: (0, 0)),
                pl.BlockSpec((N * C_in, K * K), lambda n: (0, 0)),
                pl.BlockSpec((C_out, C_in), lambda n: (0, 0)),
                pl.BlockSpec((C_out, 1), lambda n: (0, 0)),
            ],
            out_specs=pl.BlockSpec((N * C_out, HW), lambda n: (0, 0)),
            scratch_shapes=[pltpu.VMEM((N * C_in, flat_w), jnp.float32)],
        ),
        compiler_params=pltpu.CompilerParams(
            dimension_semantics=("arbitrary",)),
        cost_estimate=pl.CostEstimate(flops=flops, transcendentals=0,
                                      bytes_accessed=bytes_accessed),
    )(x_flat, dww, pww, pwb_eff)

    # Free reshape back to NCHW (contiguous) — no transpose pass.
    return out_flat.reshape(N, C_out, H_out, W_out)


def _reference(x, dw_w, dw_b, pw_w, pw_b, *, padding, dilation):
    """Pure-JAX reference (NCHW), highest precision so it is ~exact f32."""
    C_in = x.shape[1]
    prec = jax.lax.Precision.HIGHEST
    y = jax.lax.conv_general_dilated(
        x, dw_w,
        window_strides=(1, 1),
        padding=((padding, padding), (padding, padding)),
        rhs_dilation=(dilation, dilation),
        dimension_numbers=("NCHW", "OIHW", "NCHW"),
        feature_group_count=C_in,
        precision=prec,
    ) + dw_b.reshape(1, -1, 1, 1)
    z = jax.lax.conv_general_dilated(
        y, pw_w,
        window_strides=(1, 1),
        padding=((0, 0), (0, 0)),
        dimension_numbers=("NCHW", "OIHW", "NCHW"),
        precision=prec,
    ) + pw_b.reshape(1, -1, 1, 1)
    return z


if __name__ == "__main__":
    # Config consistent with the module: in_channels=4, out_channels=8,
    # kernel_size=3, padding=1, dilation=1 ("same" conv), batch=2, 16x16.
    N, C_in, H, W = 2, 4, 16, 16
    C_out, K, padding, dilation = 8, 3, 1, 1

    key = jax.random.PRNGKey(0)
    kx, k1, k2, k3, k4 = jax.random.split(key, 5)

    x = jax.random.normal(kx, (N, C_in, H, W), dtype=jnp.float32)
    # PyTorch Conv2d parameter shapes:
    dw_weight = jax.random.normal(k1, (C_in, 1, K, K), dtype=jnp.float32) * 0.1
    dw_bias = jax.random.normal(k2, (C_in,), dtype=jnp.float32) * 0.1
    pw_weight = jax.random.normal(k3, (C_out, C_in, 1, 1), dtype=jnp.float32) * 0.1
    pw_bias = jax.random.normal(k4, (C_out,), dtype=jnp.float32) * 0.1

    out = depthwise_separable_conv(x, dw_weight, dw_bias, pw_weight, pw_bias,
                                   padding=padding, dilation=dilation)
    out = jax.block_until_ready(out)

    ref = _reference(x, dw_weight, dw_bias, pw_weight, pw_bias,
                     padding=padding, dilation=dilation)
    assert out.shape == ref.shape, (out.shape, ref.shape)
    max_err = float(jnp.max(jnp.abs(out - ref)))
    assert jnp.allclose(out, ref, atol=1e-4, rtol=1e-4), max_err

    print("KERNEL_OK")
</pallas_src>

<mosaic_0001>
module attributes {stable_mosaic.version = 11 : i64} {
  func.func @_dwsep_kernel(%arg0: i32, %arg1: memref<8x256xf32, #tpu.memory_space<vmem>>, %arg2: memref<8x9xf32, #tpu.memory_space<vmem>>, %arg3: memref<8x4xf32, #tpu.memory_space<vmem>>, %arg4: memref<8x1xf32, #tpu.memory_space<vmem>>, %arg5: memref<16x256xf32, #tpu.memory_space<vmem>>, %arg6: memref<8x401xf32, #tpu.memory_space<vmem>>) attributes {dimension_semantics = [#tpu.dimension_semantics<arbitrary>], iteration_bounds = array<i64: 1>, scalar_prefetch = 0 : i64, scratch_operands = 1 : i64, tpu.core_type = #tpu.core_type<tc>, window_params = [{pipeline_mode = #tpu.pipeline_mode<synchronous>, transform_indices = @transform_0, window_bounds = array<i64: 8, 256>}, {pipeline_mode = #tpu.pipeline_mode<synchronous>, transform_indices = @transform_1, window_bounds = array<i64: 8, 9>}, {pipeline_mode = #tpu.pipeline_mode<synchronous>, transform_indices = @transform_2, window_bounds = array<i64: 8, 4>}, {pipeline_mode = #tpu.pipeline_mode<synchronous>, transform_indices = @transform_3, window_bounds = array<i64: 8, 1>}, {pipeline_mode = #tpu.pipeline_mode<synchronous>, transform_indices = @transform_4, window_bounds = array<i64: 16, 256>}]} {
    %cst = arith.constant 0.000000e+00 : f32
    %0 = vector.broadcast %cst : f32 to vector<8x128xf32>
    %c0 = arith.constant 0 : index
    %c0_0 = arith.constant 0 : index
    %1 = vector.load %arg6[%c0, %c0_0] : memref<8x401xf32, #tpu.memory_space<vmem>>, vector<8x128xf32>
    tpu.vector_store %arg6[%c0, %c0_0], %0 {strides = array<i32>} : memref<8x401xf32, #tpu.memory_space<vmem>>, vector<8x128xf32>,
    %cst_1 = arith.constant 0.000000e+00 : f32
    %2 = vector.broadcast %cst_1 : f32 to vector<8x17xf32>
    %c0_2 = arith.constant 0 : index
    %c384 = arith.constant 384 : index
    %3 = vector.load %arg6[%c0_2, %c384] : memref<8x401xf32, #tpu.memory_space<vmem>>, vector<8x17xf32>
    tpu.vector_store %arg6[%c0_2, %c384], %2 {strides = array<i32>} : memref<8x401xf32, #tpu.memory_space<vmem>>, vector<8x17xf32>,
    %c0_3 = arith.constant 0 : index
    %c0_4 = arith.constant 0 : index
    %4 = vector.load %arg1[%c0_3, %c0_4] : memref<8x256xf32, #tpu.memory_space<vmem>>, vector<8x256xf32>
    %c0_5 = arith.constant 0 : index
    %c128 = arith.constant 128 : index
    %5 = vector.load %arg6[%c0_5, %c128] : memref<8x401xf32, #tpu.memory_space<vmem>>, vector<8x256xf32>
    tpu.vector_store %arg6[%c0_5, %c128], %4 {strides = array<i32>} : memref<8x401xf32, #tpu.memory_space<vmem>>, vector<8x256xf32>,
    %c0_6 = arith.constant 0 : index
    %c0_7 = arith.constant 0 : index
    %6 = vector.load %arg2[%c0_6, %c0_7] : memref<8x9xf32, #tpu.memory_space<vmem>>, vector<8x9xf32>
    %7 = tpu.iota {dimensions = array<i32: 1>} : vector<1x256xi32>
    %c16_i32 = arith.constant 16 : i32
    %c0_i32 = arith.constant 0 : i32
    %8 = arith.cmpi eq, %c16_i32, %c0_i32 : i32
    %c1_i32 = arith.constant 1 : i32
    %9 = arith.select %8, %c1_i32, %c16_i32 : i32
    %10 = vector.broadcast %9 : i32 to vector<1x256xi32>
    %11 = arith.remsi %7, %10 : vector<1x256xi32>
    %c0_i32_8 = arith.constant 0 : i32
    %12 = vector.broadcast %c0_i32_8 : i32 to vector<1x256xi32>
    %13 = arith.cmpi ne, %11, %12 : vector<1x256xi32>
    %c0_i32_9 = arith.constant 0 : i32
    %14 = vector.broadcast %c0_i32_9 : i32 to vector<1x256xi32>
    %15 = arith.cmpi slt, %11, %14 : vector<1x256xi32>
    %c0_i32_10 = arith.constant 0 : i32
    %16 = arith.cmpi slt, %9, %c0_i32_10 : i32
    %17 = vector.broadcast %16 : i1 to vector<1x256xi1>
    %18 = vector.broadcast %17 : vector<1x256xi1> to vector<1x256xi1>
    %19 = arith.xori %15, %18 : vector<1x256xi1>
    %20 = arith.andi %19, %13 : vector<1x256xi1>
    %21 = vector.broadcast %9 : i32 to vector<1x256xi32>
    %22 = arith.addi %11, %21 : vector<1x256xi32>
    %23 = arith.select %20, %22, %11 : vector<1x256xi1>, vector<1x256xi32>
    %c1_i32_11 = arith.constant 1 : i32
    %24 = vector.broadcast %c1_i32_11 : i32 to vector<1x256xi32>
    %25 = arith.cmpi sge, %23, %24 : vector<1x256xi32>
    %c17_i32 = arith.constant 17 : i32
    %26 = vector.broadcast %c17_i32 : i32 to vector<1x256xi32>
    %27 = arith.cmpi slt, %23, %26 : vector<1x256xi32>
    %28 = arith.andi %25, %27 : vector<1x256xi1>
    %c-1_i32 = arith.constant -1 : i32
    %29 = vector.broadcast %c-1_i32 : i32 to vector<1x256xi32>
    %30 = arith.cmpi sge, %23, %29 : vector<1x256xi32>
    %c15_i32 = arith.constant 15 : i32
    %31 = vector.broadcast %c15_i32 : i32 to vector<1x256xi32>
    %32 = arith.cmpi slt, %23, %31 : vector<1x256xi32>
    %33 = arith.andi %30, %32 : vector<1x256xi1>
    %cst_12 = arith.constant 0.000000e+00 : f32
    %34 = vector.broadcast %cst_12 : f32 to vector<8x256xf32>
    %c0_13 = arith.constant 0 : index
    %c111 = arith.constant 111 : index
    %35 = vector.load %arg6[%c0_13, %c111] : memref<8x401xf32, #tpu.memory_space<vmem>>, vector<8x256xf32>
    %cst_14 = arith.constant 0.000000e+00 : f32
    %36 = vector.shape_cast %28 : vector<1x256xi1> to vector<1x256xi1>
    %37 = vector.broadcast %36 : vector<1x256xi1> to vector<8x256xi1>
    %38 = vector.broadcast %cst_14 : f32 to vector<8x256xf32>
    %39 = arith.select %37, %35, %38 : vector<8x256xi1>, vector<8x256xf32>
    %40 = vector.extract_strided_slice %6 {offsets = [0, 0], sizes = [8, 1], strides = [1, 1]} : vector<8x9xf32> to vector<8x1xf32>
    %41 = vector.broadcast %40 : vector<8x1xf32> to vector<8x256xf32>
    %42 = arith.mulf %39, %41 : vector<8x256xf32>
    %43 = arith.addf %34, %42 : vector<8x256xf32>
    %c0_15 = arith.constant 0 : index
    %c112 = arith.constant 112 : index
    %44 = vector.load %arg6[%c0_15, %c112] : memref<8x401xf32, #tpu.memory_space<vmem>>, vector<8x256xf32>
    %45 = vector.extract_strided_slice %6 {offsets = [0, 1], sizes = [8, 1], strides = [1, 1]} : vector<8x9xf32> to vector<8x1xf32>
    %46 = vector.broadcast %45 : vector<8x1xf32> to vector<8x256xf32>
    %47 = arith.mulf %44, %46 : vector<8x256xf32>
    %48 = arith.addf %43, %47 : vector<8x256xf32>
    %c0_16 = arith.constant 0 : index
    %c113 = arith.constant 113 : index
    %49 = vector.load %arg6[%c0_16, %c113] : memref<8x401xf32, #tpu.memory_space<vmem>>, vector<8x256xf32>
    %cst_17 = arith.constant 0.000000e+00 : f32
    %50 = vector.shape_cast %33 : vector<1x256xi1> to vector<1x256xi1>
    %51 = vector.broadcast %50 : vector<1x256xi1> to vector<8x256xi1>
    %52 = vector.broadcast %cst_17 : f32 to vector<8x256xf32>
    %53 = arith.select %51, %49, %52 : vector<8x256xi1>, vector<8x256xf32>
    %54 = vector.extract_strided_slice %6 {offsets = [0, 2], sizes = [8, 1], strides = [1, 1]} : vector<8x9xf32> to vector<8x1xf32>
    %55 = vector.broadcast %54 : vector<8x1xf32> to vector<8x256xf32>
    %56 = arith.mulf %53, %55 : vector<8x256xf32>
    %57 = arith.addf %48, %56 : vector<8x256xf32>
    %c0_18 = arith.constant 0 : index
    %c127 = arith.constant 127 : index
    %58 = vector.load %arg6[%c0_18, %c127] : memref<8x401xf32, #tpu.memory_space<vmem>>, vector<8x256xf32>
    %cst_19 = arith.constant 0.000000e+00 : f32
    %59 = vector.shape_cast %28 : vector<1x256xi1> to vector<1x256xi1>
    %60 = vector.broadcast %59 : vector<1x256xi1> to vector<8x256xi1>
    %61 = vector.broadcast %cst_19 : f32 to vector<8x256xf32>
    %62 = arith.select %60, %58, %61 : vector<8x256xi1>, vector<8x256xf32>
    %63 = vector.extract_strided_slice %6 {offsets = [0, 3], sizes = [8, 1], strides = [1, 1]} : vector<8x9xf32> to vector<8x1xf32>
    %64 = vector.broadcast %63 : vector<8x1xf32> to vector<8x256xf32>
    %65 = arith.mulf %62, %64 : vector<8x256xf32>
    %66 = arith.addf %57, %65 : vector<8x256xf32>
    %c0_20 = arith.constant 0 : index
    %c128_21 = arith.constant 128 : index
    %67 = vector.load %arg6[%c0_20, %c128_21] : memref<8x401xf32, #tpu.memory_space<vmem>>, vector<8x256xf32>
    %68 = vector.extract_strided_slice %6 {offsets = [0, 4], sizes = [8, 1], strides = [1, 1]} : vector<8x9xf32> to vector<8x1xf32>
    %69 = vector.broadcast %68 : vector<8x1xf32> to vector<8x256xf32>
    %70 = arith.mulf %67, %69 : vector<8x256xf32>
    %71 = arith.addf %66, %70 : vector<8x256xf32>
    %c0_22 = arith.constant 0 : index
    %c129 = arith.constant 129 : index
    %72 = vector.load %arg6[%c0_22, %c129] : memref<8x401xf32, #tpu.memory_space<vmem>>, vector<8x256xf32>
    %cst_23 = arith.constant 0.000000e+00 : f32
    %73 = vector.shape_cast %33 : vector<1x256xi1> to vector<1x256xi1>
    %74 = vector.broadcast %73 : vector<1x256xi1> to vector<8x256xi1>
    %75 = vector.broadcast %cst_23 : f32 to vector<8x256xf32>
    %76 = arith.select %74, %72, %75 : vector<8x256xi1>, vector<8x256xf32>
    %77 = vector.extract_strided_slice %6 {offsets = [0, 5], sizes = [8, 1], strides = [1, 1]} : vector<8x9xf32> to vector<8x1xf32>
    %78 = vector.broadcast %77 : vector<8x1xf32> to vector<8x256xf32>
    %79 = arith.mulf %76, %78 : vector<8x256xf32>
    %80 = arith.addf %71, %79 : vector<8x256xf32>
    %c0_24 = arith.constant 0 : index
    %c143 = arith.constant 143 : index
    %81 = vector.load %arg6[%c0_24, %c143] : memref<8x401xf32, #tpu.memory_space<vmem>>, vector<8x256xf32>
    %cst_25 = arith.constant 0.000000e+00 : f32
    %82 = vector.shape_cast %28 : vector<1x256xi1> to vector<1x256xi1>
    %83 = vector.broadcast %82 : vector<1x256xi1> to vector<8x256xi1>
    %84 = vector.broadcast %cst_25 : f32 to vector<8x256xf32>
    %85 = arith.select %83, %81, %84 : vector<8x256xi1>, vector<8x256xf32>
    %86 = vector.extract_strided_slice %6 {offsets = [0, 6], sizes = [8, 1], strides = [1, 1]} : vector<8x9xf32> to vector<8x1xf32>
    %87 = vector.broadcast %86 : vector<8x1xf32> to vector<8x256xf32>
    %88 = arith.mulf %85, %87 : vector<8x256xf32>
    %89 = arith.addf %80, %88 : vector<8x256xf32>
    %c0_26 = arith.constant 0 : index
    %c144 = arith.constant 144 : index
    %90 = vector.load %arg6[%c0_26, %c144] : memref<8x401xf32, #tpu.memory_space<vmem>>, vector<8x256xf32>
    %91 = vector.extract_strided_slice %6 {offsets = [0, 7], sizes = [8, 1], strides = [1, 1]} : vector<8x9xf32> to vector<8x1xf32>
    %92 = vector.broadcast %91 : vector<8x1xf32> to vector<8x256xf32>
    %93 = arith.mulf %90, %92 : vector<8x256xf32>
    %94 = arith.addf %89, %93 : vector<8x256xf32>
    %c0_27 = arith.constant 0 : index
    %c145 = arith.constant 145 : index
    %95 = vector.load %arg6[%c0_27, %c145] : memref<8x401xf32, #tpu.memory_space<vmem>>, vector<8x256xf32>
    %cst_28 = arith.constant 0.000000e+00 : f32
    %96 = vector.shape_cast %33 : vector<1x256xi1> to vector<1x256xi1>
    %97 = vector.broadcast %96 : vector<1x256xi1> to vector<8x256xi1>
    %98 = vector.broadcast %cst_28 : f32 to vector<8x256xf32>
    %99 = arith.select %97, %95, %98 : vector<8x256xi1>, vector<8x256xf32>
    %100 = vector.extract_strided_slice %6 {offsets = [0, 8], sizes = [8, 1], strides = [1, 1]} : vector<8x9xf32> to vector<8x1xf32>
    %101 = vector.broadcast %100 : vector<8x1xf32> to vector<8x256xf32>
    %102 = arith.mulf %99, %101 : vector<8x256xf32>
    %103 = arith.addf %94, %102 : vector<8x256xf32>
    %c0_29 = arith.constant 0 : index
    %c0_30 = arith.constant 0 : index
    %104 = vector.load %arg3[%c0_29, %c0_30] : memref<8x4xf32, #tpu.memory_space<vmem>>, vector<8x4xf32>
    %c0_31 = arith.constant 0 : index
    %c0_32 = arith.constant 0 : index
    %105 = vector.load %arg4[%c0_31, %c0_32] : memref<8x1xf32, #tpu.memory_space<vmem>>, vector<8x1xf32>
    %106 = vector.extract_strided_slice %103 {offsets = [0, 0], sizes = [4, 256], strides = [1, 1]} : vector<8x256xf32> to vector<4x256xf32>
    %cst_33 = arith.constant 0.000000e+00 : f32
    %107 = vector.broadcast %cst_33 : f32 to vector<8x256xf32>
    %108 = vector.extract_strided_slice %104 {offsets = [0, 0], sizes = [8, 1], strides = [1, 1]} : vector<8x4xf32> to vector<8x1xf32>
    %109 = vector.extract_strided_slice %106 {offsets = [0, 0], sizes = [1, 256], strides = [1, 1]} : vector<4x256xf32> to vector<1x256xf32>
    %110 = vector.broadcast %108 : vector<8x1xf32> to vector<8x256xf32>
    %111 = vector.broadcast %109 : vector<1x256xf32> to vector<8x256xf32>
    %112 = arith.mulf %110, %111 : vector<8x256xf32>
    %113 = arith.addf %107, %112 : vector<8x256xf32>
    %114 = vector.extract_strided_slice %104 {offsets = [0, 1], sizes = [8, 1], strides = [1, 1]} : vector<8x4xf32> to vector<8x1xf32>
    %115 = vector.extract_strided_slice %106 {offsets = [1, 0], sizes = [1, 256], strides = [1, 1]} : vector<4x256xf32> to vector<1x256xf32>
    %116 = vector.broadcast %114 : vector<8x1xf32> to vector<8x256xf32>
    %117 = vector.broadcast %115 : vector<1x256xf32> to vector<8x256xf32>
    %118 = arith.mulf %116, %117 : vector<8x256xf32>
    %119 = arith.addf %113, %118 : vector<8x256xf32>
    %120 = vector.extract_strided_slice %104 {offsets = [0, 2], sizes = [8, 1], strides = [1, 1]} : vector<8x4xf32> to vector<8x1xf32>
    %121 = vector.extract_strided_slice %106 {offsets = [2, 0], sizes = [1, 256], strides = [1, 1]} : vector<4x256xf32> to vector<1x256xf32>
    %122 = vector.broadcast %120 : vector<8x1xf32> to vector<8x256xf32>
    %123 = vector.broadcast %121 : vector<1x256xf32> to vector<8x256xf32>
    %124 = arith.mulf %122, %123 : vector<8x256xf32>
    %125 = arith.addf %119, %124 : vector<8x256xf32>
    %126 = vector.extract_strided_slice %104 {offsets = [0, 3], sizes = [8, 1], strides = [1, 1]} : vector<8x4xf32> to vector<8x1xf32>
    %127 = vector.extract_strided_slice %106 {offsets = [3, 0], sizes = [1, 256], strides = [1, 1]} : vector<4x256xf32> to vector<1x256xf32>
    %128 = vector.broadcast %126 : vector<8x1xf32> to vector<8x256xf32>
    %129 = vector.broadcast %127 : vector<1x256xf32> to vector<8x256xf32>
    %130 = arith.mulf %128, %129 : vector<8x256xf32>
    %131 = arith.addf %125, %130 : vector<8x256xf32>
    %132 = vector.broadcast %105 : vector<8x1xf32> to vector<8x256xf32>
    %133 = arith.addf %131, %132 : vector<8x256xf32>
    %c0_34 = arith.constant 0 : index
    %c0_35 = arith.constant 0 : index
    %134 = vector.load %arg5[%c0_34, %c0_35] : memref<16x256xf32, #tpu.memory_space<vmem>>, vector<8x256xf32>
    tpu.vector_store %arg5[%c0_34, %c0_35], %133 {strides = array<i32>} : memref<16x256xf32, #tpu.memory_space<vmem>>, vector<8x256xf32>,
    %135 = vector.extract_strided_slice %103 {offsets = [4, 0], sizes = [4, 256], strides = [1, 1]} : vector<8x256xf32> to vector<4x256xf32>
    %cst_36 = arith.constant 0.000000e+00 : f32
    %136 = vector.broadcast %cst_36 : f32 to vector<8x256xf32>
    %137 = vector.extract_strided_slice %104 {offsets = [0, 0], sizes = [8, 1], strides = [1, 1]} : vector<8x4xf32> to vector<8x1xf32>
    %138 = vector.extract_strided_slice %135 {offsets = [0, 0], sizes = [1, 256], strides = [1, 1]} : vector<4x256xf32> to vector<1x256xf32>
    %139 = vector.broadcast %137 : vector<8x1xf32> to vector<8x256xf32>
    %140 = vector.broadcast %138 : vector<1x256xf32> to vector<8x256xf32>
    %141 = arith.mulf %139, %140 : vector<8x256xf32>
    %142 = arith.addf %136, %141 : vector<8x256xf32>
    %143 = vector.extract_strided_slice %104 {offsets = [0, 1], sizes = [8, 1], strides = [1, 1]} : vector<8x4xf32> to vector<8x1xf32>
    %144 = vector.extract_strided_slice %135 {offsets = [1, 0], sizes = [1, 256], strides = [1, 1]} : vector<4x256xf32> to vector<1x256xf32>
    %145 = vector.broadcast %143 : vector<8x1xf32> to vector<8x256xf32>
    %146 = vector.broadcast %144 : vector<1x256xf32> to vector<8x256xf32>
    %147 = arith.mulf %145, %146 : vector<8x256xf32>
    %148 = arith.addf %142, %147 : vector<8x256xf32>
    %149 = vector.extract_strided_slice %104 {offsets = [0, 2], sizes = [8, 1], strides = [1, 1]} : vector<8x4xf32> to vector<8x1xf32>
    %150 = vector.extract_strided_slice %135 {offsets = [2, 0], sizes = [1, 256], strides = [1, 1]} : vector<4x256xf32> to vector<1x256xf32>
    %151 = vector.broadcast %149 : vector<8x1xf32> to vector<8x256xf32>
    %152 = vector.broadcast %150 : vector<1x256xf32> to vector<8x256xf32>
    %153 = arith.mulf %151, %152 : vector<8x256xf32>
    %154 = arith.addf %148, %153 : vector<8x256xf32>
    %155 = vector.extract_strided_slice %104 {offsets = [0, 3], sizes = [8, 1], strides = [1, 1]} : vector<8x4xf32> to vector<8x1xf32>
    %156 = vector.extract_strided_slice %135 {offsets = [3, 0], sizes = [1, 256], strides = [1, 1]} : vector<4x256xf32> to vector<1x256xf32>
    %157 = vector.broadcast %155 : vector<8x1xf32> to vector<8x256xf32>
    %158 = vector.broadcast %156 : vector<1x256xf32> to vector<8x256xf32>
    %159 = arith.mulf %157, %158 : vector<8x256xf32>
    %160 = arith.addf %154, %159 : vector<8x256xf32>
    %161 = vector.broadcast %105 : vector<8x1xf32> to vector<8x256xf32>
    %162 = arith.addf %160, %161 : vector<8x256xf32>
    %c8 = arith.constant 8 : index
    %c0_37 = arith.constant 0 : index
    %163 = vector.load %arg5[%c8, %c0_37] : memref<16x256xf32, #tpu.memory_space<vmem>>, vector<8x256xf32>
    tpu.vector_store %arg5[%c8, %c0_37], %162 {strides = array<i32>} : memref<16x256xf32, #tpu.memory_space<vmem>>, vector<8x256xf32>,
    return
  }
  func.func @transform_0(%arg0: i32) -> (i32, i32) {
    %c0_i32 = arith.constant 0 : i32
    %c0_i32_0 = arith.constant 0 : i32
    %c0_i32_1 = arith.constant 0 : i32
    return %c0_i32, %c0_i32_0 : i32, i32
  }
  func.func @transform_1(%arg0: i32) -> (i32, i32) {
    %c0_i32 = arith.constant 0 : i32
    %c0_i32_0 = arith.constant 0 : i32
    %c0_i32_1 = arith.constant 0 : i32
    return %c0_i32, %c0_i32_0 : i32, i32
  }
  func.func @transform_2(%arg0: i32) -> (i32, i32) {
    %c0_i32 = arith.constant 0 : i32
    %c0_i32_0 = arith.constant 0 : i32
    %c0_i32_1 = arith.constant 0 : i32
    return %c0_i32, %c0_i32_0 : i32, i32
  }
  func.func @transform_3(%arg0: i32) -> (i32, i32) {
    %c0_i32 = arith.constant 0 : i32
    %c0_i32_0 = arith.constant 0 : i32
    %c0_i32_1 = arith.constant 0 : i32
    return %c0_i32, %c0_i32_0 : i32, i32
  }
  func.func @transform_4(%arg0: i32) -> (i32, i32) {
    %c0_i32 = arith.constant 0 : i32
    %c0_i32_0 = arith.constant 0 : i32
    %c0_i32_1 = arith.constant 0 : i32
    return %c0_i32, %c0_i32_0 : i32, i32
  }
}

</mosaic_0001>

<bundles_post_ra>
// kernel: tpu_custom_call.1
= control target key start
LH: loop header
LB: loop body
LE: loop exit
PB: predicated region body
PF: predicated region fallthrough
CT: control target
= control target key end

     0   :  { %v467_v1 = vmov 1   ;;  %v468_v2 = vmov 0   ;;  %vm19_vm0 = vcmask 138240   ;;  %v469_v5 = vmov 0.0   ;;  %s635_s0 = inlined_call_operand.vmem [shape: f32[8,256], index: 0, kind: input, shape index: {}]   ;;  %s636_s1 = inlined_call_operand.vmem [shape: f32[8,9], index: 1, kind: input, shape index: {}]   ;;  %s637_s2 = inlined_call_operand.vmem [shape: f32[8,4], index: 2, kind: input, shape index: {}]   ;;  %s638_s3 = inlined_call_operand.vmem [shape: f32[8,1], index: 3, kind: input, shape index: {}]   ;;  %s639_s4 = inlined_call_operand.hbm [shape: f32[16,256], index: 4, kind: output, shape index: {}]  }
   0x1   :  { %v25_v0 = vld [vmem:[%s636_s1] sm:$0xff]  ;;  %429 = vset.pattern.permute.xlu0 %v467_v1  ;;  %431 = vset.pattern.permute.xlu1 %v468_v2  ;;  %v524_v4 = vld [vmem:[%s635_s0 + $0x8] sm:$0xff]  ;;  %20 = vst.msk [vmem:[#allocation2 + $0x18] sm:$0xff] %vm19_vm0, %v469_v5 }
   0x2   :  { %v519_v3 = vld [vmem:[%s635_s0] sm:$0xff]  ;;  %97 = vperm.xlu0 %429, %v25_v0   ;;  %89 = vperm.xlu1 %431, %v25_v0  }
   0x3   :  { %9 = vsyncpa [#allocation4], 0  ;;  %v470_v6 = vmov 7   ;;  %v471_v7 = vmov 2   ;;  %v472_v8 = vmov 3   ;;  %s473_s1 = smov 17   ;;  %v26_v43 = vlaneseq }
   0x4   :  { %v474_v9 = vmov 6   ;;  %v475_v10 = vmov 4   ;;  %s476_s0 = smov 15   ;;  %v477_v11 = vmov 5   ;;  %s478_s21 = smov 1   ;;  %v481_v13 = vmov 8  }
   0x5   :  { %s479_s22 = smov 127   ;;  %s480_s23 = smov 113   ;;  %v265_v21 = vld [vmem:[%s637_s2] sm:$0xff]  ;;  %v27_v45 = vand.u32 127, %v26_v43  ;;  %vm129_vm3 = vcmask 121856   ;;  %vm112_vm4 = vcmask 130048  }
   0x6   :  { %430 = vset.pattern.permute.xlu0 %v470_v6  ;;  %432 = vset.pattern.permute.xlu1 %v471_v7  ;;  %s482_s24 = smov 111   ;;  %s483_s25 = smov 16   ;;  %v266_v23 = vld [vmem:[%s638_s3] sm:$0xff]  ;;  %vm150_vm7 = vcmask 7168   ;;  %vm185_vm8 = vcmask 1039360   ;;  %vm206_vm9 = vcmask 924672  }
   0x7   :  { %222 = vperm.xlu0 %430, %v25_v0   ;;  %137 = vperm.xlu1 %432, %v25_v0   ;;  %s484_s26 = smov 112   ;;  %v28_v47 = vadd.s32 128, %v27_v45  ;;  %v33_v50 = vand.u32 15, %v27_v45  ;;  %vm250_vm10 = vcmask 908288   ;;  %vm237_vm11 = vcmask 916480   ;;  %s485_s2 = smov [#allocation3]  }
   0x8   :  { %v175_v12 = vld [vmem:[#allocation2 + $0x18] sm:$0xff]  ;;  %s398_s3 = sshll.u32 %s485_s2, 4  ;;  %s399_s3 = int_to_ptr.vmem [resolvable:$true] %s398_s3 }
   0x9   :  { %v40_v51 = vand.u32 15, %v28_v47  ;;  %vm567_vm1 = vcmp.ge.s32.totalorder %v33_v50, 1  ;;  %vm579_vm5 = vcmp.lt.s32.totalorder %v33_v50, 15  ;;  %s443_s5 = scalar_lea.vmem %s399_s3, 512  ;;  %p448_p1 = scmp.lt.s32.totalorder %s399_s3, %s399_s3 }
   0xa   :  { %p444_p0 = scmp.ne.s32.totalorder %s399_s3, %s443_s5  ;;  %p449_p2 = scmp.lt.s32.totalorder %s443_s5, %s443_s5 }
   0xb   :  { %433 = vset.pattern.permute.xlu0 %v472_v8  ;;  %75 = vrot.lane.b32.xlu1 %v469_v5, %s473_s1  ;;  %vm572_vm2 = vcmp.ge.s32.totalorder %v40_v51, 1  ;;  %vm585_vm6 = vcmp.lt.s32.totalorder %v40_v51, 15 }
   0xc   :  { %158 = vperm.xlu0 %433, %v25_v0   ;;  %436 = vset.pattern.permute.xlu1 %v474_v9  ;;  %p450_p3 = por %p449_p2, %p448_p1 }
   0xe   :  { %p451_p4 = pnand %p450_p3, %p444_p0 }
   0xf   :  { %77 = vrot.lane.b32.xlu1 %v519_v3, %s473_s1 }
  0x10   :  { %434 = vset.pattern.permute.xlu0 %v475_v10 }
  0x11   :  { %166 = vperm.xlu0 %434, %v25_v0  }
  0x13   :  { %79 = vrot.lane.b32.xlu1 %v524_v4, %s473_s1 }
  0x15   :  { %127 = vrot.lane.b32.xlu0 %v524_v4, %s476_s0 }
  0x16   :  { %435 = vset.pattern.permute.xlu0 %v477_v11 }
  0x17   :  { %123 = vrot.lane.b32.xlu1 %v469_v5, %s476_s0 }
  0x19   :  { %193 = vperm.xlu0 %435, %v25_v0  }
  0x1b   :  { %125 = vrot.lane.b32.xlu1 %v519_v3, %s476_s0 }
  0x1d   :  { %148 = vrot.lane.b32.xlu0 %v524_v4, %s478_s21 }
  0x1e   :  { %439 = vset.pattern.permute.xlu0 %v467_v1 }
  0x1f   :  { %144 = vrot.lane.b32.xlu1 %v469_v5, %s478_s21 }
  0x21   :  { %179 = vrot.lane.b32.xlu0 %v519_v3, %s479_s22 }
  0x23   :  { %146 = vrot.lane.b32.xlu1 %v519_v3, %s478_s21 }
  0x25   :  { %183 = vrot.lane.b32.xlu0 %v175_v12, %s479_s22 }
  0x27   :  { %214 = vperm.xlu1 %436, %v25_v0  }
  0x29   :  { %200 = vrot.lane.b32.xlu0 %v519_v3, %s480_s23 }
  0x2b   :  { %181 = vrot.lane.b32.xlu1 %v524_v4, %s479_s22 }
  0x2c   :  { %437 = vset.pattern.permute.xlu1 %v481_v13 }
  0x2d   :  { %204 = vrot.lane.b32.xlu0 %v175_v12, %s480_s23 }
  0x2f   :  { %258 = vperm.xlu1 %437, %v25_v0  }
  0x31   :  { %246 = vrot.lane.b32.xlu0 %v524_v4, %s482_s24 }
  0x33   :  { %202 = vrot.lane.b32.xlu1 %v524_v4, %s480_s23 }
  0x34   :  { %438 = vset.pattern.permute.xlu1 %v468_v2 }
  0x37   :  { %244 = vrot.lane.b32.xlu1 %v519_v3, %s482_s24 }
  0x3b   :  { %248 = vrot.lane.b32.xlu1 %v175_v12, %s482_s24 }
  0x81   :  { %v98_v14 = vpop.permute.xlu0 %97  ;;  %v90_v24 = vpop.permute.xlu1 %89 }
  0x82   :  { %v100_v15 = vmul.f32 0.0, %v98_v14  ;;  %v101_v16 = vmul.f32 %v98_v14, %v519_v3  ;;  %v102_v17 = vmul.f32 %v98_v14, %v524_v4 }
  0x84   :  { %108 = vrot.lane.b32.xlu0 %v101_v16, %s483_s25  ;;  %106 = vrot.lane.b32.xlu1 %v100_v15, %s483_s25 }
  0x86   :  { %v223_v18 = vpop.permute.xlu0 %222  ;;  %v138_v25 = vpop.permute.xlu1 %137 }
  0x87   :  { %v225_v19 = vmul.f32 %v223_v18, %v519_v3  ;;  %v227_v20 = vmul.f32 %v223_v18, %v175_v12  ;;  %v226_v22 = vmul.f32 %v223_v18, %v524_v4 }
  0x88   :  { %110 = vrot.lane.b32.xlu1 %v102_v17, %s483_s25 }
  0x89   :  { %231 = vrot.lane.b32.xlu0 %v225_v19, %s484_s26 }
  0x8a   :  { %v76_v26 = vpop.permute.xlu1 %75 }
  0x8b   :  { %v159_v29 = vpop.permute.xlu0 %158 }
  0x8c   :  { %269 = vperm.xlu1 %438, %v265_v21  }
  0x8d   :  { %235 = vrot.lane.b32.xlu0 %v227_v20, %s484_s26 }
  0x8e   :  { %v78_v27 = vpop.permute.xlu1 %77 }
  0x8f   :  { %v81_v55 = vsel %vm19_vm0, %v76_v26, %v78_v27 }
  0x90   :  { %233 = vrot.lane.b32.xlu1 %v226_v22, %s484_s26  ;;  %v558_v31 = vpop.permute.xlu0 %166  ;;  %v85_v58 = vsel %vm567_vm1, %v81_v55, 0.0 }
  0x91   :  { %440 = vset.pattern.permute.xlu1 %v471_v7  ;;  %285 = vperm.xlu0 %439, %v265_v21   ;;  %v92_v5 = vmul.f32 %v90_v24, %v85_v58 }
  0x92   :  { %v80_v28 = vpop.permute.xlu1 %79 }
  0x93   :  { %v82_v57 = vsel %vm19_vm0, %v78_v27, %v80_v28  ;;  %v169_v28 = vmul.f32 %v558_v31, %v519_v3 }
  0x94   :  { %301 = vperm.xlu1 %440, %v265_v21   ;;  %v128_v34 = vpop.permute.xlu0 %127  ;;  %v86_v62 = vsel %vm572_vm2, %v82_v57, 0.0 }
  0x95   :  { %442 = vset.pattern.permute.xlu0 %v468_v2  ;;  %v93_v6 = vmul.f32 %v90_v24, %v86_v62 }
  0x96   :  { %334 = vperm.xlu0 %442, %v266_v23   ;;  %v124_v30 = vpop.permute.xlu1 %123 }
  0x98   :  { %441 = vset.pattern.permute.xlu1 %v472_v8  ;;  %v560_v35 = vpop.permute.xlu0 %193 }
  0x99   :  { %317 = vperm.xlu1 %441, %v265_v21  }
  0x9a   :  { %v126_v32 = vpop.permute.xlu1 %125 }
  0x9b   :  { %v130_v0 = vsel %vm129_vm3, %v124_v30, %v126_v32  ;;  %v131_v1 = vsel %vm129_vm3, %v126_v32, %v128_v34 }
  0x9c   :  { %v149_v38 = vpop.permute.xlu0 %148  ;;  %v134_v7 = vsel %vm579_vm5, %v130_v0, 0.0  ;;  %v135_v8 = vsel %vm585_vm6, %v131_v1, 0.0 }
  0x9d   :  { %v140_v15 = vmul.f32 %v138_v25, %v134_v7  ;;  %v141_v16 = vmul.f32 %v138_v25, %v135_v8  ;;  %v170_v25 = vmul.f32 %v558_v31, %v524_v4 }
  0x9e   :  { %v145_v33 = vpop.permute.xlu1 %144 }
  0xa0   :  { %v180_v40 = vpop.permute.xlu0 %179 }
  0xa2   :  { %v147_v36 = vpop.permute.xlu1 %146 }
  0xa3   :  { %v151_v10 = vsel %vm150_vm7, %v145_v33, %v147_v36  ;;  %v152_v11 = vsel %vm150_vm7, %v147_v36, %v149_v38 }
  0xa4   :  { %v184_v42 = vpop.permute.xlu0 %183  ;;  %v155_v17 = vsel %vm567_vm1, %v151_v10, 0.0  ;;  %v156_v18 = vsel %vm572_vm2, %v152_v11, 0.0 }
  0xa5   :  { %v161_v21 = vmul.f32 %v159_v29, %v155_v17  ;;  %v162_v22 = vmul.f32 %v159_v29, %v156_v18 }
  0xa6   :  { %v562_v37 = vpop.permute.xlu1 %214 }
  0xa8   :  { %v201_v46 = vpop.permute.xlu0 %200 }
  0xaa   :  { %v182_v39 = vpop.permute.xlu1 %181 }
  0xab   :  { %v186_v23 = vsel %vm185_vm8, %v180_v40, %v182_v39  ;;  %v187_v24 = vsel %vm185_vm8, %v182_v39, %v184_v42 }
  0xac   :  { %v205_v49 = vpop.permute.xlu0 %204  ;;  %v190_v30 = vsel %vm579_vm5, %v186_v23, 0.0  ;;  %v191_v32 = vsel %vm585_vm6, %v187_v24, 0.0 }
  0xad   :  { %v196_v38 = vmul.f32 %v560_v35, %v190_v30  ;;  %v197_v39 = vmul.f32 %v560_v35, %v191_v32 }
  0xae   :  { %v564_v41 = vpop.permute.xlu1 %258 }
  0xb0   :  { %v247_v52 = vpop.permute.xlu0 %246 }
  0xb2   :  { %v203_v44 = vpop.permute.xlu1 %202 }
  0xb3   :  { %v207_v33 = vsel %vm206_vm9, %v201_v46, %v203_v44  ;;  %v208_v34 = vsel %vm206_vm9, %v203_v44, %v205_v49  ;;  %v273_v44 = vshrl.u32 %v26_v43, 7 }
  0xb4   :  { %v211_v3 = vsel %vm567_vm1, %v207_v33, 0.0  ;;  %v212_v4 = vsel %vm572_vm2, %v208_v34, 0.0 }
  0xb5   :  { %v217_v49 = vmul.f32 %v562_v37, %v211_v3  ;;  %v218_v50 = vmul.f32 %v562_v37, %v212_v4  ;;  %v306_v57 = vsub.s32 2, %v273_v44  ;;  %v367_v58 = vsub.s32 6, %v273_v44 }
  0xb6   :  { %v245_v48 = vpop.permute.xlu1 %244  ;;  %v274_v62 = vsub.s32 0, %v273_v44  ;;  %v290_v59 = vsub.s32 1, %v273_v44  ;;  %v379_v7 = vsub.s32 7, %v273_v44 }
  0xb7   :  { %v251_v31 = vsel %vm250_vm10, %v245_v48, %v247_v52 }
  0xb8   :  { %v255_v35 = vsel %vm579_vm5, %v251_v31, 0.0 }
  0xb9   :  { %v261_v43 = vmul.f32 %v564_v41, %v255_v35 }
  0xba   :  { %v249_v53 = vpop.permute.xlu1 %248 }
  0xbb   :  { %v252_v42 = vsel %vm250_vm10, %v247_v52, %v249_v53 }
  0xbc   :  { %v256_v51 = vsel %vm585_vm6, %v252_v42, 0.0 }
  0xf6   :  { %v109_v60 = vpop.permute.xlu0 %108  ;;  %v107_v61 = vpop.permute.xlu1 %106 }
  0xf7   :  { %v113_v2 = vsel %vm112_vm4, %v107_v61, %v109_v60 }
  0xf8   :  { %v117_v12 = vadd.f32 %v113_v2, %v92_v5  ;;  %v343_v2 = vsub.s32 4, %v273_v44  ;;  %v355_v5 = vsub.s32 5, %v273_v44 }
  0xfa   :  { %v111_v9 = vpop.permute.xlu1 %110  ;;  %v142_v19 = vadd.f32 %v140_v15, %v117_v12 }
  0xfb   :  { %v114_v13 = vsel %vm112_vm4, %v109_v60, %v111_v9  ;;  %v232_v40 = vpop.permute.xlu0 %231  ;;  %v262_v60 = vmul.f32 %v564_v41, %v256_v51 }
  0xfc   :  { %v118_v14 = vadd.f32 %v114_v13, %v93_v6  ;;  %v163_v26 = vadd.f32 %v161_v21, %v142_v19  ;;  %v322_v6 = vsub.s32 3, %v273_v44 }
  0xfe   :  { %v143_v20 = vadd.f32 %v141_v16, %v118_v14  ;;  %v171_v29 = vadd.f32 %v169_v28, %v163_v26 }
  0xff   :  { %v236_v54 = vpop.permute.xlu0 %235 }
 0x100   :  { %v164_v27 = vadd.f32 %v162_v22, %v143_v20  ;;  %v198_v47 = vadd.f32 %v196_v38, %v171_v29 }
 0x102   :  { %v172_v36 = vadd.f32 %v170_v25, %v164_v27  ;;  %v219_v55 = vadd.f32 %v217_v49, %v198_v47 }
 0x104   :  { %v199_v46 = vadd.f32 %v197_v39, %v172_v36 }
 0x106   :  { %v220_v48 = vadd.f32 %v218_v50, %v199_v46 }
 0x10b   :  { %v270_v45 = vpop.permute.xlu1 %269 }
 0x10f   :  { %v234_v52 = vpop.permute.xlu1 %233 }
 0x110   :  { %v238_v53 = vsel %vm237_vm11, %v232_v40, %v234_v52  ;;  %v239_v56 = vsel %vm237_vm11, %v234_v52, %v236_v54  ;;  %v286_v12 = vpop.permute.xlu0 %285 }
 0x111   :  { %v242_v37 = vadd.f32 %v238_v53, %v219_v55  ;;  %v243_v61 = vadd.f32 %v239_v56, %v220_v48 }
 0x113   :  { %v263_v0 = vadd.f32 %v261_v43, %v242_v37  ;;  %v264_v1 = vadd.f32 %v262_v60, %v243_v61  ;;  %v302_v63 = vpop.permute.xlu1 %301 }
 0x115   :  { %v307_v8 = vrot.slane %v263_v0, %v306_v57  ;;  %v311_v9 = vrot.slane %v264_v1, %v306_v57  ;;  %v368_v10 = vrot.slane %v263_v0, %v367_v58  ;;  %v372_v11 = vrot.slane %v264_v1, %v367_v58  ;;  %v335_v35 = vpop.permute.xlu0 %334 }
 0x116   :  { %v275_v13 = vrot.slane %v263_v0, %v274_v62  ;;  %v279_v14 = vrot.slane %v264_v1, %v274_v62  ;;  %v291_v15 = vrot.slane %v263_v0, %v290_v59  ;;  %v295_v41 = vrot.slane %v264_v1, %v290_v59 }
 0x117   :  { %v312_v16 = vmul.f32 %v307_v8, %v302_v63  ;;  %v313_v17 = vmul.f32 %v311_v9, %v302_v63  ;;  %v373_v18 = vmul.f32 %v368_v10, %v302_v63  ;;  %v374_v19 = vmul.f32 %v372_v11, %v302_v63 }
 0x118   :  { %v280_v20 = vmul.f32 %v275_v13, %v270_v45  ;;  %v281_v21 = vmul.f32 %v279_v14, %v270_v45  ;;  %v296_v22 = vmul.f32 %v291_v15, %v286_v12  ;;  %v297_v23 = vmul.f32 %v295_v41, %v286_v12  ;;  %v318_v25 = vpop.permute.xlu1 %317 }
 0x119   :  { %v344_v24 = vrot.slane %v263_v0, %v343_v2  ;;  %v348_v26 = vrot.slane %v264_v1, %v343_v2  ;;  %v356_v27 = vrot.slane %v263_v0, %v355_v5  ;;  %v360_v28 = vrot.slane %v264_v1, %v355_v5 }
 0x11a   :  { %v298_v30 = vadd.f32 %v296_v22, %v280_v20  ;;  %v299_v32 = vadd.f32 %v297_v23, %v281_v21  ;;  %v323_v33 = vrot.slane %v263_v0, %v322_v6  ;;  %v327_v34 = vrot.slane %v264_v1, %v322_v6 }
 0x11b   :  { %v349_v29 = vmul.f32 %v344_v24, %v270_v45  ;;  %v350_v36 = vmul.f32 %v348_v26, %v270_v45  ;;  %v361_v38 = vmul.f32 %v356_v27, %v286_v12  ;;  %v362_v39 = vmul.f32 %v360_v28, %v286_v12 }
 0x11c   :  { %v380_v40 = vrot.slane %v263_v0, %v379_v7  ;;  %v384_v3 = vrot.slane %v264_v1, %v379_v7  ;;  %v328_v4 = vmul.f32 %v323_v33, %v318_v25  ;;  %v329_v31 = vmul.f32 %v327_v34, %v318_v25 }
 0x11d   :  { %v363_v42 = vadd.f32 %v361_v38, %v349_v29  ;;  %v364_v47 = vadd.f32 %v362_v39, %v350_v36  ;;  %v314_v46 = vadd.f32 %v312_v16, %v298_v30  ;;  %v315_v44 = vadd.f32 %v313_v17, %v299_v32 }
 0x11e   :  { %v385_v49 = vmul.f32 %v380_v40, %v318_v25  ;;  %v386_v50 = vmul.f32 %v384_v3, %v318_v25 }
 0x11f   :  { %v330_v51 = vadd.f32 %v328_v4, %v314_v46  ;;  %v331_v54 = vadd.f32 %v329_v31, %v315_v44  ;;  %v375_v55 = vadd.f32 %v373_v18, %v363_v42  ;;  %v376_v48 = vadd.f32 %v374_v19, %v364_v47 }
 0x121   :  { %v337_v45 = vadd.f32 %v335_v35, %v330_v51  ;;  %v338_v52 = vadd.f32 %v335_v35, %v331_v54  ;;  %v387_v53 = vadd.f32 %v385_v49, %v375_v55  ;;  %v388_v56 = vadd.f32 %v386_v50, %v376_v48 }
 0x123   :  { %339 = vst [vmem:[#allocation3] sm:$0xff] %v337_v45  ;;  %340 = vst [vmem:[#allocation3 + $0x8] sm:$0xff] %v338_v52  ;;  %v389_v57 = vadd.f32 %v387_v53, %v335_v35  ;;  %v390_v58 = vadd.f32 %v388_v56, %v335_v35 }
 0x125   :  { %391 = vst [vmem:[#allocation3 + $0x10] sm:$0xff] %v389_v57  ;;  %392 = vst [vmem:[#allocation3 + $0x18] sm:$0xff] %v390_v58 }
 0x126   :  { %454 = shalt.err (!%p451_p4)
}
 0x127   :  { %s455_s8 = scalar_lea.hbm %s639_s4, 512 }
 0x128   :  { %p456_p5 = scmp.ne.s32.totalorder %s639_s4, %s455_s8  ;;  %p459_p6 = scmp.lt.u32.totalorder %s455_s8, %s639_s4 }
 0x12a   :  { %p461_p7 = pnand %p459_p6, %p456_p5 }
 0x12c   :  { %464 = shalt.err (!%p461_p7)
}
 0x12d   :  { %s486_s13 = smov 256  }
 0x12e   :  { %404 = dma.vmem_to_hbm [thread:$0]  %s399_s3, 512, %s639_s4, [#allocation4], %s486_s13, %s486_s13, %s483_s25  }
 0x12f   :  { %465 = dma.done.wait [#allocation4], 512  }
 0x130   :  { %466 = vsyncadd [#allocation4], 4294966784 }
 0x131   :  { %408 = vsyncpa [#allocation4], 1 }

</bundles_post_ra>
